<compile_context>
chip_gen: v6e
topology: v6e:2x2x1
jax: 0.10.0
libtpu: 0.0.40
codegen_flags: <defaults>
</compile_context>

<pallas_src>
import math

import jax
import jax.numpy as jnp
from jax.experimental import pallas as pl
from jax.experimental.pallas import tpu as pltpu

_MIB = 1 << 20
_LANE = 128
_TARGET_GRID_STEPS = 4            # >= 2 steps per TensorCore on v7x megacore
_BASE_VMEM_LIMIT = 32 * _MIB      # > v5e's 16 MiB scoped default, < v7x's 64 MiB physical
_VMEM_SLACK = 2 * _MIB            # headroom for compiler-internal scratch
_MAX_FOLD_GROUPS = 32             # max unrolled channel groups in the folded kernel
_MAX_FOLD_MATRIX_BYTES = 8 * _MIB # cap for the two resident indicator matrices


def _cdiv(a, b):
    return -(-a // b)


def _round_up(x, m):
    return _cdiv(x, m) * m


def _padded_vmem_bytes(shape, dtype):
    """VMEM footprint of an array after (sublane, lane) tiling/padding."""
    itemsize = jnp.dtype(dtype).itemsize
    sublane = 8 * max(1, 4 // itemsize)          # f32: 8, bf16: 16, int8: 32
    shape = tuple(shape)
    if len(shape) < 2:
        shape = (1,) * (2 - len(shape)) + shape
    lead = 1
    for d in shape[:-2]:
        lead *= int(d)
    return lead * _round_up(int(shape[-2]), sublane) * _round_up(int(shape[-1]), _LANE) * itemsize


def _fold_group_size(hw, c, dtype):
    """Channel-group size g folded into the lane axis, or 1 for no fold."""
    if hw % _LANE == 0:
        return 1
    g = _LANE // math.gcd(hw, _LANE)             # minimal g with (g*hw) % 128 == 0
    if g <= 1 or c % g != 0 or c // g > _MAX_FOLD_GROUPS:
        return 1
    # The two resident (L, g)/(g, L) indicator matrices must stay small.
    if 2 * _padded_vmem_bytes((g * hw, g), dtype) > _MAX_FOLD_MATRIX_BYTES:
        return 1
    return g


# ----------------------------------------------------------------------------
# Kernels
# ----------------------------------------------------------------------------
def _se_kernel_flat(x_ref, dwt_ref, db_ref, uwt_ref, ub_ref, o_ref):
    """H*W already lane-dense (or no legal fold): plain single-pass SE."""
    # x_ref: (Bt, C, HW); dwt_ref: (C, I); db_ref: (1, I); uwt_ref: (I, C); ub_ref: (1, C)
    x = x_ref[...]                                            # input dtype, no f32 copy
    pooled = jnp.mean(x, axis=-1, dtype=jnp.float32)          # (Bt, C) global avg pool
    hidden = jnp.dot(pooled, dwt_ref[...],
                     preferred_element_type=jnp.float32) + db_ref[...]
    hidden = jnp.maximum(hidden, 0.0)                         # (Bt, I)
    logits = jnp.dot(hidden, uwt_ref[...],
                     preferred_element_type=jnp.float32) + ub_ref[...]
    scale = jax.nn.sigmoid(logits).astype(x.dtype)            # (Bt, C)
    o_ref[...] = x * scale[:, :, None]


def _make_folded_kernel(hw, num_groups):
    """SE kernel for the channel-folded lane-dense layout (Bt, C/g, g*HW)."""
    inv_hw = 1.0 / float(hw)

    def kernel(x_ref, dwt_ref, db_ref, uwt_ref, ub_ref, pool_ref, bcast_ref, o_ref):
        # x_ref:    (Bt, Cg, L)   L = g*HW; lane k*HW+t <-> channel offset k in group
        # dwt_ref:  (Cg, g, I)    down 1x1 weight, group-major (pre-reshaped)
        # db_ref:   (1, I)
        # uwt_ref:  (Cg, I, g)    up 1x1 weight, group-major (pre-reshaped)
        # ub_ref:   (Cg, g)
        # pool_ref: (L, g)        {0,1}: lane -> channel offset within the group
        # bcast_ref:(g, L)        its transpose
        bt = x_ref.shape[0]
        n_internal = dwt_ref.shape[-1]

        # ---- squeeze: per-channel means via an indicator matmul, then the down
        # projection, accumulated over channel groups (static unroll, MXU slack).
        acc = jnp.zeros((bt, n_internal), jnp.float32)
        for c in range(num_groups):
            xc = x_ref[:, c, :]                               # (Bt, L)
            pooled_c = jnp.dot(xc, pool_ref[...],
                               preferred_element_type=jnp.float32) * inv_hw   # (Bt, g)
            acc = acc + jnp.dot(pooled_c, dwt_ref[c],
                                preferred_element_type=jnp.float32)           # (Bt, I)
        hidden = jnp.maximum(acc + db_ref[...], 0.0)          # (Bt, I)

        # ---- excite: per-group up projection + sigmoid, re-broadcast over the
        # HW lanes of each channel with the transposed indicator, then rescale.
        for c in range(num_groups):
            logits_c = (jnp.dot(hidden, uwt_ref[c],
                                preferred_element_type=jnp.float32)
                        + ub_ref[pl.ds(c, 1), :])             # (Bt, g)
            scale_c = jax.nn.sigmoid(logits_c).astype(x_ref.dtype)
            scale_l = jnp.dot(scale_c, bcast_ref[...],
                              preferred_element_type=jnp.float32
                              ).astype(x_ref.dtype)           # (Bt, L)
            o_ref[:, c, :] = x_ref[:, c, :] * scale_l

    return kernel


# ----------------------------------------------------------------------------
# Wrapper
# ----------------------------------------------------------------------------
def se_block(x, down_w, down_b, up_w, up_b):
    """x: (B, C, H, W); down_w: (I, C); down_b: (I,); up_w: (C, I); up_b: (C,)."""
    B, C, H, W = x.shape
    # PyTorch uses avg_pool2d(kernel_size=W): full-map pooling assumes square maps.
    assert H == W, "SEBlock assumes square feature maps (avg_pool2d(kernel_size=W))"
    hw = H * W
    n_internal = down_w.shape[0]

    g = _fold_group_size(hw, C, x.dtype)
    cg = C // g
    lanes = g * hw
    x2 = x.reshape(B, cg, lanes)             # pure reshape of contiguous data

    # Hoist transposes / reshapes of the tiny weights out of the kernel.
    db2 = down_b.reshape(1, n_internal)
    if g == 1:
        kernel = _se_kernel_flat
        weights = [down_w.T, db2, up_w.T, up_b.reshape(1, C)]
        weight_specs = [
            pl.BlockSpec((C, n_internal), lambda b: (0, 0)),     # resident weights
            pl.BlockSpec((1, n_internal), lambda b: (0, 0)),
            pl.BlockSpec((n_internal, C), lambda b: (0, 0)),
            pl.BlockSpec((1, C), lambda b: (0, 0)),
        ]
    else:
        kernel = _make_folded_kernel(hw, cg)
        dwt = down_w.T.reshape(cg, g, n_internal)                # (Cg, g, I)
        uwt = jnp.transpose(up_w.T.reshape(n_internal, cg, g), (1, 0, 2))   # (Cg, I, g)
        ub2 = up_b.reshape(cg, g)
        lane_chan = jnp.repeat(jnp.arange(g, dtype=jnp.int32), hw)          # (lanes,)
        pool_mat = (lane_chan[:, None] == jnp.arange(g, dtype=jnp.int32)[None, :]
                    ).astype(x.dtype)                            # (lanes, g) {0,1}
        bcast_mat = jnp.transpose(pool_mat)                      # (g, lanes)
        weights = [dwt, db2, uwt, ub2, pool_mat, bcast_mat]
        weight_specs = [
            pl.BlockSpec((cg, g, n_internal), lambda b: (0, 0, 0)),
            pl.BlockSpec((1, n_internal), lambda b: (0, 0)),
            pl.BlockSpec((cg, n_internal, g), lambda b: (0, 0, 0)),
            pl.BlockSpec((cg, g), lambda b: (0, 0)),
            pl.BlockSpec((lanes, g), lambda b: (0, 0)),
            pl.BlockSpec((g, lanes), lambda b: (0, 0)),
        ]

    # ---- VMEM budgeting with real (padded) tile sizes.
    per_row_bytes = _padded_vmem_bytes((cg, lanes), x.dtype)     # one batch row
    weight_bytes = 2 * sum(_padded_vmem_bytes(w.shape, w.dtype) for w in weights)
    io_budget = _BASE_VMEM_LIMIT - _VMEM_SLACK - weight_bytes
    bt_vmem = max(1, io_budget // (4 * per_row_bytes))           # 2 bufs x (in + out)
    # Keep >= _TARGET_GRID_STEPS grid steps so the DMA pipeline overlaps and
    # both v7x TensorCores get work; bt no longer has to divide B.
    bt = int(max(1, min(bt_vmem, _cdiv(B, _TARGET_GRID_STEPS), B)))
    grid = (_cdiv(B, bt),)

    needed = weight_bytes + _VMEM_SLACK + 4 * bt * per_row_bytes
    vmem_limit = int(min(max(_BASE_VMEM_LIMIT, needed), 64 * _MIB))
    # TODO(synk): add a two-pass spatially tiled variant for feature maps where
    # even a single batch row (4x padded bytes + weights) exceeds the VMEM limit.

    out = pl.pallas_call(
        kernel,
        out_shape=jax.ShapeDtypeStruct((B, cg, lanes), x.dtype),
        grid_spec=pltpu.PrefetchScalarGridSpec(
            num_scalar_prefetch=0,
            grid=grid,
            in_specs=[pl.BlockSpec((bt, cg, lanes), lambda b: (b, 0, 0))] + weight_specs,
            out_specs=pl.BlockSpec((bt, cg, lanes), lambda b: (b, 0, 0)),
        ),
        compiler_params=pltpu.CompilerParams(
            dimension_semantics=("parallel",),      # batch grid axis -> megacore sharding
            vmem_limit_bytes=vmem_limit,
        ),
    )(x2, *weights)

    return out.reshape(B, C, H, W)


def se_block_ref(x, down_w, down_b, up_w, up_b):
    """Plain-JAX reference mirroring the PyTorch forward."""
    pooled = jnp.mean(x, axis=(2, 3))                        # (B, C)
    h = jnp.maximum(pooled @ down_w.T + down_b, 0.0)         # (B, I)
    s = jax.nn.sigmoid(h @ up_w.T + up_b)                    # (B, C)
    return x * s[:, :, None, None]


if __name__ == "__main__":
    key = jax.random.PRNGKey(0)
    k = jax.random.split(key, 10)

    # ---- Test 1: lane-dense spatial axis (HW = 256), flat kernel path.
    B, C, NI, H, W = 2, 4, 2, 16, 16     # input_channels=4, internal_neurons=2
    x = jax.random.normal(k[0], (B, C, H, W), dtype=jnp.float32)
    down_w = 0.1 * jax.random.normal(k[1], (NI, C), dtype=jnp.float32)
    down_b = 0.1 * jax.random.normal(k[2], (NI,), dtype=jnp.float32)
    up_w = 0.1 * jax.random.normal(k[3], (C, NI), dtype=jnp.float32)
    up_b = 0.1 * jax.random.normal(k[4], (C,), dtype=jnp.float32)

    out = jax.block_until_ready(se_block(x, down_w, down_b, up_w, up_b))
    ref = se_block_ref(x, down_w, down_b, up_w, up_b)
    assert out.shape == x.shape
    assert jnp.allclose(out, ref, atol=1e-5, rtol=1e-5), "flat-path mismatch vs reference"

    # ---- Test 2: 7x7 map (HW = 49, not a multiple of 128) -> channel-folded
    # lane-dense path, plus a ragged batch grid (B=5, bt=2 -> 3 grid steps).
    B2, C2, NI2, H2, W2 = 5, 256, 16, 7, 7
    x_b = jax.random.normal(k[5], (B2, C2, H2, W2), dtype=jnp.float32)
    dw_b = 0.2 * jax.random.normal(k[6], (NI2, C2), dtype=jnp.float32)
    db_b = 0.2 * jax.random.normal(k[7], (NI2,), dtype=jnp.float32)
    uw_b = 0.2 * jax.random.normal(k[8], (C2, NI2), dtype=jnp.float32)
    ub_b = 0.2 * jax.random.normal(k[9], (C2,), dtype=jnp.float32)

    out2 = jax.block_until_ready(se_block(x_b, dw_b, db_b, uw_b, ub_b))
    ref2 = se_block_ref(x_b, dw_b, db_b, uw_b, ub_b)
    assert out2.shape == x_b.shape
    # Looser tolerance: the folded path's indicator matmuls run at the MXU's
    # default f32 precision (bf16 passes), ~1e-3 relative; structural bugs
    # (e.g. a channel permutation) would show up as >1e-1 errors.
    assert jnp.allclose(out2, ref2, atol=2e-2, rtol=2e-2), "folded-path mismatch vs reference"

    print("KERNEL_OK")
</pallas_src>

<mosaic_0001>
module attributes {stable_mosaic.version = 11 : i64} {
  func.func @_se_kernel_flat(%arg0: i32, %arg1: memref<1x4x256xf32, #tpu.memory_space<vmem>>, %arg2: memref<4x2xf32, #tpu.memory_space<vmem>>, %arg3: memref<1x2xf32, #tpu.memory_space<vmem>>, %arg4: memref<2x4xf32, #tpu.memory_space<vmem>>, %arg5: memref<1x4xf32, #tpu.memory_space<vmem>>, %arg6: memref<1x4x256xf32, #tpu.memory_space<vmem>>) attributes {dimension_semantics = [#tpu.dimension_semantics<parallel>], iteration_bounds = array<i64: 2>, scalar_prefetch = 0 : i64, scratch_operands = 0 : i64, tpu.core_type = #tpu.core_type<tc>, window_params = [{transform_indices = @transform_0, window_bounds = array<i64: 1, 4, 256>}, {pipeline_mode = #tpu.pipeline_mode<synchronous>, transform_indices = @transform_1, window_bounds = array<i64: 4, 2>}, {pipeline_mode = #tpu.pipeline_mode<synchronous>, transform_indices = @transform_2, window_bounds = array<i64: 1, 2>}, {pipeline_mode = #tpu.pipeline_mode<synchronous>, transform_indices = @transform_3, window_bounds = array<i64: 2, 4>}, {pipeline_mode = #tpu.pipeline_mode<synchronous>, transform_indices = @transform_4, window_bounds = array<i64: 1, 4>}, {transform_indices = @transform_5, window_bounds = array<i64: 1, 4, 256>}]} {
    %c0 = arith.constant 0 : index
    %c0_0 = arith.constant 0 : index
    %c0_1 = arith.constant 0 : index
    %0 = vector.load %arg1[%c0, %c0_0, %c0_1] : memref<1x4x256xf32, #tpu.memory_space<vmem>>, vector<1x4x256xf32>
    %cst = arith.constant dense<0.000000e+00> : vector<1x4xf32>
    %1 = vector.multi_reduction <add>, %0, %cst [2] : vector<1x4x256xf32> to vector<1x4xf32>
    %cst_2 = arith.constant 2.560000e+02 : f32
    %2 = vector.broadcast %cst_2 : f32 to vector<1x4xf32>
    %3 = arith.divf %1, %2 : vector<1x4xf32>
    %c0_3 = arith.constant 0 : index
    %c0_4 = arith.constant 0 : index
    %4 = vector.load %arg2[%c0_3, %c0_4] : memref<4x2xf32, #tpu.memory_space<vmem>>, vector<4x2xf32>
    %cst_5 = arith.constant dense<0.000000e+00> : vector<1x2xf32>
    %5 = tpu.matmul %3, %4, %cst_5 {dimension_numbers = #tpu.dot_dimension_numbers<[1], [0], [0], [1], [0, 0, 1, 1], [], []>} : vector<1x4xf32>, vector<4x2xf32>, vector<1x2xf32> -> vector<1x2xf32>
    %c0_6 = arith.constant 0 : index
    %c0_7 = arith.constant 0 : index
    %6 = vector.load %arg3[%c0_6, %c0_7] : memref<1x2xf32, #tpu.memory_space<vmem>>, vector<1x2xf32>
    %7 = arith.addf %5, %6 : vector<1x2xf32>
    %cst_8 = arith.constant 0.000000e+00 : f32
    %8 = vector.broadcast %cst_8 : f32 to vector<1x2xf32>
    %9 = arith.maximumf %7, %8 : vector<1x2xf32>
    %c0_9 = arith.constant 0 : index
    %c0_10 = arith.constant 0 : index
    %10 = vector.load %arg4[%c0_9, %c0_10] : memref<2x4xf32, #tpu.memory_space<vmem>>, vector<2x4xf32>
    %cst_11 = arith.constant dense<0.000000e+00> : vector<1x4xf32>
    %11 = tpu.matmul %9, %10, %cst_11 {dimension_numbers = #tpu.dot_dimension_numbers<[1], [0], [0], [1], [0, 0, 1, 1], [], []>} : vector<1x2xf32>, vector<2x4xf32>, vector<1x4xf32> -> vector<1x4xf32>
    %c0_12 = arith.constant 0 : index
    %c0_13 = arith.constant 0 : index
    %12 = vector.load %arg5[%c0_12, %c0_13] : memref<1x4xf32, #tpu.memory_space<vmem>>, vector<1x4xf32>
    %13 = arith.addf %11, %12 : vector<1x4xf32>
    %14 = arith.negf %13 : vector<1x4xf32>
    %15 = math.exp %14 : vector<1x4xf32>
    %cst_14 = arith.constant 1.000000e+00 : f32
    %16 = vector.broadcast %cst_14 : f32 to vector<1x4xf32>
    %17 = arith.addf %16, %15 : vector<1x4xf32>
    %18 = arith.divf %16, %17 : vector<1x4xf32>
    %19 = vector.shape_cast %18 : vector<1x4xf32> to vector<1x4x1xf32>
    %20 = vector.broadcast %19 : vector<1x4x1xf32> to vector<1x4x256xf32>
    %21 = arith.mulf %0, %20 : vector<1x4x256xf32>
    %c0_15 = arith.constant 0 : index
    %c0_16 = arith.constant 0 : index
    %c0_17 = arith.constant 0 : index
    %22 = vector.load %arg6[%c0_15, %c0_16, %c0_17] : memref<1x4x256xf32, #tpu.memory_space<vmem>>, vector<1x4x256xf32>
    tpu.vector_store %arg6[%c0_15, %c0_16, %c0_17], %21 {strides = array<i32>} : memref<1x4x256xf32, #tpu.memory_space<vmem>>, vector<1x4x256xf32>,
    return
  }
  func.func @transform_0(%arg0: i32) -> (i32, i32, i32) {
    %c0_i32 = arith.constant 0 : i32
    %c0_i32_0 = arith.constant 0 : i32
    %c0_i32_1 = arith.constant 0 : i32
    return %arg0, %c0_i32, %c0_i32_0 : i32, i32, i32
  }
  func.func @transform_1(%arg0: i32) -> (i32, i32) {
    %c0_i32 = arith.constant 0 : i32
    %c0_i32_0 = arith.constant 0 : i32
    %c0_i32_1 = arith.constant 0 : i32
    return %c0_i32, %c0_i32_0 : i32, i32
  }
  func.func @transform_2(%arg0: i32) -> (i32, i32) {
    %c0_i32 = arith.constant 0 : i32
    %c0_i32_0 = arith.constant 0 : i32
    %c0_i32_1 = arith.constant 0 : i32
    return %c0_i32, %c0_i32_0 : i32, i32
  }
  func.func @transform_3(%arg0: i32) -> (i32, i32) {
    %c0_i32 = arith.constant 0 : i32
    %c0_i32_0 = arith.constant 0 : i32
    %c0_i32_1 = arith.constant 0 : i32
    return %c0_i32, %c0_i32_0 : i32, i32
  }
  func.func @transform_4(%arg0: i32) -> (i32, i32) {
    %c0_i32 = arith.constant 0 : i32
    %c0_i32_0 = arith.constant 0 : i32
    %c0_i32_1 = arith.constant 0 : i32
    return %c0_i32, %c0_i32_0 : i32, i32
  }
  func.func @transform_5(%arg0: i32) -> (i32, i32, i32) {
    %c0_i32 = arith.constant 0 : i32
    %c0_i32_0 = arith.constant 0 : i32
    %c0_i32_1 = arith.constant 0 : i32
    return %arg0, %c0_i32, %c0_i32_0 : i32, i32, i32
  }
}

</mosaic_0001>

<bundles_post_ra>
// kernel: tpu_custom_call.1
= control target key start
LH: loop header
LB: loop body
LE: loop exit
PB: predicated region body
PF: predicated region fallthrough
CT: control target
= control target key end

     0   :  { %10 = vsyncpa [#allocation3], 0  ;;  %s903_s0 = inlined_call_operand.hbm [shape: f32[2,4,256], index: 0, kind: input, shape index: {}]   ;;  %s904_s1 = inlined_call_operand.vmem [shape: f32[4,2], index: 1, kind: input, shape index: {}]   ;;  %s905_s2 = inlined_call_operand.vmem [shape: f32[1,2], index: 2, kind: input, shape index: {}]   ;;  %s906_s3 = inlined_call_operand.vmem [shape: f32[2,4], index: 3, kind: input, shape index: {}]   ;;  %s907_s4 = inlined_call_operand.vmem [shape: f32[1,4], index: 4, kind: input, shape index: {}]   ;;  %s908_s5 = inlined_call_operand.hbm [shape: f32[2,4,256], index: 5, kind: output, shape index: {}]  }
   0x1   :  { %12 = vsyncpa [#allocation3 + $0x1], 0 }
   0x2   :  { %13 = vsyncpa [#allocation4], 0 }
   0x3   :  { %15 = vsyncpa [#allocation4 + $0x1], 0  ;;  %s746_s18 = smov 0   ;;  %s748_s19 = smov 0  }
   0x4   :  { %s750_s20 = smov 0   ;;  %s752_s21 = smov 0  }
   0x5 LB: > { %s767_s22 = sadd.s32 4294967295, %s709_s21   ;;  %s528_s23 = sadd.s32 4294967294, %s709_s21   ;;  %s709_s21 = sphi %s752_s21, %s925_s21   ;;  %s705_s20 = sphi %s750_s20, %s924_s20   ;;  %s701_s19 = sphi %s748_s19, %s923_s19   ;;  %s697_s18 = sphi %s746_s18, %s922_s18  }
   0x6   : > { %s771_s24 = sadd.s32 1, %s709_s21   ;;  %s28_s25 = sadd.s32 1, %s705_s20 }
   0x7   : > { %s25_s26 = ssub.s32 %s709_s21, %s771_s24  ;;  %p35_p0 = scmp.ne.s32.totalorder %s705_s20, %s701_s19 }
   0x8   : > { %p26_p1 = scmp.eq.s32.totalorder %s25_s26, 0  ;;  %p36_p2 = scmp.eq.s32.totalorder %s709_s21, 0 }
   0x9   : > { %p41_p3 = scmp.ne.s32.totalorder %s701_s19, %s697_s18  ;;  %p42_p4 = scmp.eq.s32.totalorder %s767_s22, 0 }
   0xa   : > { %s783_s27 = scalar_select %p26_p1, %s705_s20, %s28_s25  }
   0xb   : > { %p785_p5 = por %p36_p2, %p35_p0  ;;  %p789_p6 = por %p42_p4, %p41_p3 }
   0xc   : > { %p149_p7 = scmp.eq.s32.totalorder %s767_s22, 1  ;;  %p155_p8 = scmp.eq.s32.totalorder %s528_s23, 1 }
   0xd   : > { %s912_s29 = scalar_select %p789_p6, 1, 0 }
   0xe   : > { %p575_p10 = scmp.lt.s32.totalorder %s709_s21, 2  ;;  %p796_p11 = por %p149_p7, %p35_p0 }
   0xf   : > { %p800_p12 = por %p155_p8, %p41_p3  ;;  %s187_s7 = sand.u32 1, %s705_s20  }
  0x10   : > { %s913_s30 = scalar_select %p796_p11, 1, 0 }
  0x11   : > { %s914_s6 = scalar_select %p800_p12, 1, 0 }
  0x12   : > { %s547_s8 = sshll.u32 %s709_s21, 7  ;;  %s531_s9 = sshll.u32 %s187_s7, 3 }
  0x13   : > { %s809_s12 = scalar_lea.hbm %s903_s0, %s547_s8  ;;  %s191_s13 = scalar_lea.vmem [#allocation2], %s531_s9 }
  0x14   : > { %s199_s14 = sshll.u32 %s191_s13, 4  ;;  %p813_p13 = pnand %p575_p10, %p785_p5  ;;  %s817_s14 = int_to_ptr.vmem [resolvable:$true] %s199_s14 }
  0x15   : > { %s188_s16 = scalar_lea.sflag [#allocation3], %s187_s7  ;;  %s617_s17 = scalar_lea.hbm %s809_s12, 128 }
  0x16   : > { %p618_p2 = scmp.ne.s32.totalorder %s809_s12, %s617_s17  ;;  %p619_p3 = pneg %p813_p13 }
  0x17   : > { %s622_s26 = scalar_lea.hbm %s903_s0, 256  ;;  %p623_p5 = scmp.lt.s32.totalorder %s809_s12, %s903_s0 }
  0x18   : > { %p620_p4 = pnand %p619_p3, %p618_p2  ;;  %p624_p8 = scmp.lt.s32.totalorder %s622_s26, %s617_s17 }
  0x1a   : > { %p621_p7 = pneg %p620_p4  ;;  %p625_p10 = por %p624_p8, %p623_p5 }
  0x1c   : > { %p626_p9 = pnand %p625_p10, %p621_p7 }
  0x1e   : > { %629 = shalt.err (!%p626_p9)
}
  0x1f   : > { %s630_s7 = scalar_lea.vmem %s817_s14, 128  ;;  %s711_s9 = smov [#allocation2]  }
  0x20   : > { %p631_p0 = scmp.ne.s32.totalorder %s817_s14, %s630_s7  ;;  %s635_s10 = sshll.u32 %s711_s9, 4  ;;  %s636_s10 = int_to_ptr.vmem [resolvable:$false] %s635_s10 }
  0x21   : > { %s637_s11 = scalar_lea.vmem %s636_s10, 256  ;;  %p638_p4 = scmp.lt.s32.totalorder %s817_s14, %s636_s10 }
  0x22   : > { %p633_p1 = pnand %p631_p0, %p619_p3  ;;  %p639_p12 = scmp.lt.s32.totalorder %s637_s11, %s630_s7 }
  0x24   : > { %p634_p2 = pneg %p633_p1  ;;  %p640_p11 = por %p639_p12, %p638_p4 }
  0x26   : > { %p641_p6 = pnand %p640_p11, %p634_p2 }
  0x28   : > { %644 = shalt.err (!%p641_p6)
}
  0x29   : > { %570 = dma.hbm_to_vmem [thread:$0]  (!%p813_p13), %s809_s12, 128, %s817_s14, %s188_s16  }
  0x2a   : > { %p916_p9 = scmp.lt.s32.totalorder %s709_s21, 3  ;;  %p917_p7 = scmp.ge.s32.totalorder %s709_s21, 1 }
  0x2c   : > { %p205_p0 = pnand %p917_p7, %p916_p9 }
  0x2d   : > { %s844_s13 = sand.u32 (!%p205_p0), 1, %s701_s19   ;;  %p918_p6 = scmp.ne.s32.totalorder (!%p205_p0), %s912_s29, 0 }
  0x2e   : > { %208 = sbr.rel (%p205_p0) target bundleno = 758 (0x2f6), region = 40  ;;  %s535_s17 = sshll.u32 (!%p205_p0), %s844_s13, 3 }
  0x2f   : > { %s211_s23 = scalar_lea.sflag (!%p205_p0), [#allocation3], %s844_s13  ;;  %s214_s15 = scalar_lea.vmem (!%p205_p0), [#allocation2], %s535_s17 }
  0x33   : > { %688 = dma.done.wait (%p918_p6), %s211_s23, 128  }
  0x34   : > { %690 = vsyncadd (%p918_p6), %s211_s23, 4294967168  ;;  %vm245_vm0 = vcmask 1043456   ;;  %v241_v0 = vld [vmem:[%s214_s15] sm:$0xff]  ;;  %v712_v5 = vmov 0.0   ;;  %vm713_vm1 = vmmov 0   ;;  %v256_v7 = vlaneseq  ;;  %s548_s7 = sshll.u32 %s767_s22, 7 }
  0x35   : > { %v243_v1 = vcombine.high %v241_v0, %v241_v0  ;;  %v246_v2 = vsel %vm245_vm0, %v241_v0, 0.0  ;;  %553 = vmatprep.subr.mxu0 %v712_v5  ;;  %v253_v6 = vld [vmem:[%s904_s1] sm:$0xf]  ;;  %558 = vmatprep.subr.mxu1 %v712_v5  ;;  %vm262_vm2 = vcmask 31744   ;;  %vm345_vm3 = vcmask 1041408   ;;  %s240_s9 = scalar_lea.vmem [#allocation5], %s535_s17  ;;  %s456_s15 = scalar_lea.hbm %s908_s5, %s548_s7 }
  0x36   : > { %554 = vmatpush3.msk.msra.mxu0 %vm245_vm0, %v253_v6  ;;  %555 = vmatprep.mubr.msk.f32.mxu0 %vm713_vm1, %v712_v5  ;;  %v257_v8 = vand.u32 127, %v256_v7  ;;  %v259_v9 = vshrl.u32 %v256_v7, 7  ;;  %v339_v14 = vld [vmem:[%s906_s3] sm:$0x3]  ;;  %vm341_vm4 = vcmask 15360   ;;  %s458_s10 = sshll.u32 %s240_s9, 4  ;;  %s459_s10 = int_to_ptr.vmem [resolvable:$true] %s458_s10 }
  0x37   : > { %v247_v3 = vsel %vm245_vm0, %v243_v1, 0.0  ;;  %560 = vmatprep.mubr.msk.f32.mxu1 %vm713_vm1, %v712_v5  ;;  %559 = vmatpush3.msk.msra.mxu1 %vm345_vm3, %v339_v14  ;;  %v254_v15 = vld [vmem:[%s905_s2] sm:$0x1]  ;;  %v714_v30 = vmov 839922192   ;;  %s444_s12 = scalar_lea.sflag [#allocation4], %s844_s13 }
  0x38   : > { %v248_v4 = vadd.f32 %v247_v3, %v246_v2  ;;  %v260_v10 = vsub.s32 %v257_v8, %v259_v9  ;;  %v340_v20 = vld [vmem:[%s907_s4] sm:$0x1]  ;;  %v427_v27 = vsub.s32 0, %v259_v9  ;;  %v434_v31 = vunpack.c.l.s4 %v714_v30  ;;  %s645_s14 = scalar_lea.vmem %s459_s10, 128  ;;  %p919_p12 = scmp.ne.s32.totalorder %s913_s30, 0 }
  0x39   : > { %p646_p11 = scmp.ne.s32.totalorder %s459_s10, %s645_s14  ;;  %s715_s29 = smov [#allocation5]  }
  0x3a   : > { %249 = vadd.xlane.f32.xlu0 %v248_v4  ;;  %v435_v32 = vunpack.c.0.s8 %v434_v31  ;;  %s649_s16 = sshll.u32 %s715_s29, 4  ;;  %s650_s16 = int_to_ptr.vmem [resolvable:$false] %s649_s16 }
  0x3b   : > { %p647_p13 = pnand %p646_p11, %p919_p12  ;;  %s651_s22 = scalar_lea.vmem %s650_s16, 256 }
  0x3c   : > { %v438_v33 = vsub.s32 %v435_v32, %v259_v9  ;;  %p652_p3 = scmp.lt.s32.totalorder %s459_s10, %s650_s16  ;;  %p653_p5 = scmp.lt.s32.totalorder %s651_s22, %s645_s14 }
  0x3d   : > { %p648_p1 = pneg %p647_p13 }
  0x3e   : > { %p654_p8 = por %p653_p5, %p652_p3 }
  0x40   : > { %p655_p10 = pnand %p654_p8, %p648_p1 }
  0xc3   : > { %v250_v11 = vpop.xlane.xlu0 %249 }
  0xc4   : > { %v252_v12 = vmul.f32 0.00390625, %v250_v11 }
  0xc6   : > { %v261_v13 = vrot.slane %v252_v12, %v260_v10 }
  0xc8   : > { %556 = vmatmul.mubr.msk.f32.vlgmr.msra.gmra.mxu0 %vm262_vm2, %v261_v13 }
 0x188   : > { %v334_v16 = vpop.f32.mrf.mxu0 }
 0x189   : > { %v335_v17 = vadd.f32 %v334_v16, %v254_v15 }
 0x18a   : > { %v557_v18 = vpop.f32.mrf.mxu0 }
 0x18b   : > { %v338_v19 = vmax.f32 %v335_v17, 0.0 }
 0x18d   : > { %561 = vmatmul.mubr.msk.f32.vlgmr.msra.gmra.mxu1 %vm341_vm4, %v338_v19 }
 0x24d   : > { %v415_v21 = vpop.f32.mrf.mxu1 }
 0x24e   : > { %v416_v22 = vadd.f32 %v415_v21, %v340_v20 }
 0x24f   : > { %v562_v23 = vpop.f32.mrf.mxu1 }
 0x250   : > { %v541_v24 = vmul.f32 -1.442695, %v416_v22 }
 0x252   : > { %613 = vpow2.f32 %v541_v24 }
 0x25f   : > { %v614_v25 = vpop.eup %613 }
 0x260   : > { %v422_v26 = vadd.f32 1.0, %v614_v25 }
 0x262   : > { %615 = vrcp.f32 %v422_v26 }
 0x26f   : > { %v616_v28 = vpop.eup %615 }
 0x270   : > { %v428_v29 = vrot.slane %v616_v28, %v427_v27 }
 0x272   : > { %430 = vbcast.lane.b32.xlu0 %v428_v29, 256 }
 0x2e4   : > { %v431_v34 = vpop.permute.xlu0 %430 }
 0x2e5   : > { %v439_v35 = vrot.slane %v431_v34, %v438_v33 }
 0x2e7   : > { %v441_v36 = vmul.f32 %v439_v35, %v241_v0 }
 0x2e9   : > { %442 = vst [vmem:[%s240_s9] sm:$0xff] %v441_v36 }
 0x2ea   : > { %658 = shalt.err (!%p655_p10)
}
 0x2eb   : > { %s659_s17 = scalar_lea.hbm %s456_s15, 128  ;;  %s663_s26 = scalar_lea.hbm %s908_s5, 256 }
 0x2ec   : > { %p660_p2 = scmp.ne.s32.totalorder %s456_s15, %s659_s17  ;;  %p664_p7 = scmp.lt.s32.totalorder %s456_s15, %s908_s5 }
 0x2ed   : > { %p665_p0 = scmp.lt.s32.totalorder %s663_s26, %s659_s17 }
 0x2ee   : > { %p661_p4 = pnand %p660_p2, %p919_p12 }
 0x2ef   : > { %p666_p6 = por %p665_p0, %p664_p7 }
 0x2f0   : > { %p662_p9 = pneg %p661_p4 }
 0x2f2   : > { %p667_p11 = pnand %p666_p6, %p662_p9 }
 0x2f4   : > { %670 = shalt.err (!%p667_p11)
}
 0x2f5   : > { %565 = dma.vmem_to_hbm [thread:$0]  (%p919_p12), %s459_s10, 128, %s456_s15, %s444_s12  }
 0x2f6 PF: > { %s470_s7 = sand.u32 1, %s697_s18   ;;  %p920_p13 = scmp.ne.s32.totalorder %s914_s6, 0 }
 0x2f7   : > { %p921_p1 = scmp.ge.s32.totalorder %s709_s21, 2  ;;  %s471_s9 = scalar_lea.sflag [#allocation4], %s470_s7 }
 0x2f9   : > { %p572_p3 = pnand %p921_p1, %p920_p13 }
 0x2fb   : > { %p573_p5 = pneg %p572_p3 }
 0x2fd   : > { %692 = dma.done.wait (%p573_p5), %s471_s9, 128  }
 0x2fe   : > { %694 = vsyncadd (%p573_p5), %s471_s9, 4294967168  ;;  %p18_p8 = scmp.ge.s32.totalorder %s771_s24, 4   ;;  %s922_s18 = smov %s701_s19 }
 0x2ff   : > { %s923_s19 = smov %s705_s20  ;;  %s924_s20 = smov %s783_s27 }
 0x300   : > { %s925_s21 = smov %s771_s24  ;;  %20 = sbr.rel (!%p18_p8) target bundleno = 5 (0x5), region = 85 }
 0x305   :  { %476 = vsyncpa [#allocation3], 1 }
 0x306   :  { %478 = vsyncpa [#allocation3 + $0x1], 1 }
 0x307   :  { %479 = vsyncpa [#allocation4], 1 }
 0x308   :  { %481 = vsyncpa [#allocation4 + $0x1], 1 }

</bundles_post_ra>
